<compile_context>
chip_gen: v5e
topology: v5e:2x2
jax: 0.10.0
libtpu: 0.0.40
codegen_flags: <defaults>
</compile_context>

<pallas_src>
import math
import functools

import jax
import jax.numpy as jnp
from jax.experimental import pallas as pl
from jax.experimental.pallas import tpu as pltpu

EPS = 1e-5


def _make_kernel(B, T, D, num_heads):
    head_dim = D // num_heads
    inv_sqrt_hd = 1.0 / math.sqrt(head_dim)
    BT = B * T

    def kernel(x_ref, wqkv_ref, bqkv_ref, wo_ref, bo_ref,
               w1_ref, w2_ref, w3_ref, s1_ref, s2_ref, o_ref):
        x = x_ref[...].reshape(BT, D)                       # (B*T, D) f32

        def rmsnorm(v, scale):                              # statistics in f32
            mean = jnp.mean(v * v, axis=-1, keepdims=True)
            return scale * (v * jax.lax.rsqrt(mean + EPS))

        # ---------------- attention sub-block ----------------
        h = rmsnorm(x, s1_ref[...]).astype(jnp.bfloat16)
        # fused Q|K|V projection: single (BT, D) @ (D, 3D) MXU matmul
        qkv = jnp.dot(h, wqkv_ref[...],
                      preferred_element_type=jnp.float32) + bqkv_ref[...]
        q = qkv[:, 0 * D:1 * D]
        k = qkv[:, 1 * D:2 * D]
        v = qkv[:, 2 * D:3 * D]

        wo = wo_ref[...]                                    # (D, D) bf16
        attn = jnp.zeros((BT, D), jnp.float32)
        for hh in range(num_heads):
            lo = hh * head_dim
            hi = lo + head_dim
            qh = q[:, lo:hi].reshape(B, T, head_dim).astype(jnp.bfloat16)
            kh = k[:, lo:hi].reshape(B, T, head_dim).astype(jnp.bfloat16)
            vh = v[:, lo:hi].reshape(B, T, head_dim).astype(jnp.bfloat16)
            # (B, T, T) scores, f32 accumulation
            e = jnp.einsum('bqd,bkd->bqk', qh, kh,
                           preferred_element_type=jnp.float32) * inv_sqrt_hd
            e = e - jnp.max(e, axis=-1, keepdims=True)
            p = jnp.exp(e)
            p = p * pl.reciprocal(jnp.sum(p, axis=-1, keepdims=True),
                                  approx=True)
            ctx = jnp.einsum('bqk,bkd->bqd', p.astype(jnp.bfloat16), vh,
                             preferred_element_type=jnp.float32)
            # recombine heads without concat: accumulate (P@V) @ Wo[head rows]
            attn = attn + jnp.dot(
                ctx.reshape(BT, head_dim).astype(jnp.bfloat16),
                wo[lo:hi, :],
                preferred_element_type=jnp.float32)
        attn = attn + bo_ref[...]

        x2 = x + attn                                       # first residual

        # ---------------- feed-forward sub-block ----------------
        # (reference quirk: fc2 is applied to fc1's output; hidden_dim == emb_dim)
        h2 = rmsnorm(x2, s2_ref[...])
        a1 = jnp.dot(h2.astype(jnp.bfloat16), w1_ref[...],
                     preferred_element_type=jnp.float32)
        a2 = jnp.dot(a1.astype(jnp.bfloat16), w2_ref[...],
                     preferred_element_type=jnp.float32)
        gated = (a1 * jax.nn.sigmoid(a1)) * a2              # SiLU(a1) * a2, in f32
        ff = jnp.dot(gated.astype(jnp.bfloat16), w3_ref[...],
                     preferred_element_type=jnp.float32)

        # final residual adds the ORIGINAL block input (as in the reference code)
        o_ref[...] = (ff + x).reshape(B, T, D).astype(o_ref.dtype)

    return kernel


@functools.partial(jax.jit, static_argnames=('num_heads',))
def transformer_pallas(x, params, num_heads):
    B, T, D = x.shape
    H = params['w1'].shape[1]
    BT = B * T
    head_dim = D // num_heads
    kernel = _make_kernel(B, T, D, num_heads)

    bf16 = jnp.bfloat16
    # fuse Q|K|V weights / biases in the wrapper (layout plumbing, not compute)
    wqkv = jnp.concatenate([params['wq'], params['wk'], params['wv']],
                           axis=1).astype(bf16)             # (D, 3D)
    bqkv = jnp.concatenate([params['bq'], params['bk'], params['bv']],
                           axis=1).astype(jnp.float32)      # (1, 3D)
    wo = params['wo'].astype(bf16)
    w1 = params['w1'].astype(bf16)
    w2 = params['w2'].astype(bf16)
    w3 = params['w3'].astype(bf16)

    args = (x, wqkv, bqkv, wo, params['bo'].astype(jnp.float32),
            w1, w2, w3,
            params['s1'].astype(jnp.float32), params['s2'].astype(jnp.float32))

    # advisory cost estimate so XLA schedules neighbors around the call
    flops = 2 * BT * D * 3 * D                               # fused QKV
    flops += 2 * 2 * B * num_heads * T * T * head_dim        # scores + ctx
    flops += 2 * BT * D * D                                  # per-head Wo accumulation
    flops += 2 * BT * D * H + 2 * BT * H * H + 2 * BT * H * D  # feed-forward
    transcendentals = (B * num_heads * T * T      # exp
                       + BT * H                   # sigmoid
                       + 2 * BT                   # rsqrt
                       + B * num_heads * T)       # reciprocal
    bytes_accessed = sum(int(a.size) * a.dtype.itemsize for a in args)
    bytes_accessed += BT * D * x.dtype.itemsize             # output

    return pl.pallas_call(
        kernel,
        out_shape=jax.ShapeDtypeStruct((B, T, D), x.dtype),
        compiler_params=pltpu.CompilerParams(
            vmem_limit_bytes=32 * 1024 * 1024),
        cost_estimate=pl.CostEstimate(
            flops=int(flops),
            transcendentals=int(transcendentals),
            bytes_accessed=int(bytes_accessed)),
    )(*args)


def transformer_ref(x, p, num_heads):
    """Pure-JAX f32 reference mirroring the PyTorch forward pass."""
    B, T, D = x.shape
    hd = D // num_heads

    def rms(v, s):
        m = jnp.mean(v * v, axis=-1, keepdims=True)
        return s * (v * jax.lax.rsqrt(m + EPS))

    h = rms(x, p['s1'])
    q = h @ p['wq'] + p['bq']
    k = h @ p['wk'] + p['bk']
    v = h @ p['wv'] + p['bv']
    q = q.reshape(B, T, num_heads, hd).transpose(0, 2, 1, 3)
    k = k.reshape(B, T, num_heads, hd).transpose(0, 2, 1, 3)
    v = v.reshape(B, T, num_heads, hd).transpose(0, 2, 1, 3)
    e = jnp.einsum('bhqd,bhkd->bhqk', q, k) / math.sqrt(hd)
    a = jax.nn.softmax(e, axis=-1)
    o = jnp.einsum('bhqk,bhkd->bhqd', a, v).transpose(0, 2, 1, 3).reshape(B, T, D)
    o = o @ p['wo'] + p['bo']
    x2 = x + o
    h2 = rms(x2, p['s2'])
    a1 = h2 @ p['w1']
    a2 = a1 @ p['w2']
    g = (a1 * jax.nn.sigmoid(a1)) * a2
    ff = g @ p['w3']
    return ff + x


if __name__ == "__main__":
    # small config consistent with the module's forward
    B = 2
    cfg = dict(emb_dim=64, hidden_dim=64, context_length=8, num_heads=4,
               dtype=jnp.float32)
    D = cfg['emb_dim']
    H = cfg['hidden_dim']
    T = cfg['context_length']
    NH = cfg['num_heads']

    key = jax.random.PRNGKey(0)
    ks = jax.random.split(key, 16)
    scale = 0.05
    params = {
        'wq': scale * jax.random.normal(ks[0], (D, D), jnp.float32),
        'bq': scale * jax.random.normal(ks[1], (1, D), jnp.float32),
        'wk': scale * jax.random.normal(ks[2], (D, D), jnp.float32),
        'bk': scale * jax.random.normal(ks[3], (1, D), jnp.float32),
        'wv': scale * jax.random.normal(ks[4], (D, D), jnp.float32),
        'bv': scale * jax.random.normal(ks[5], (1, D), jnp.float32),
        'wo': scale * jax.random.normal(ks[6], (D, D), jnp.float32),
        'bo': scale * jax.random.normal(ks[7], (1, D), jnp.float32),
        'w1': scale * jax.random.normal(ks[8], (D, H), jnp.float32),
        'w2': scale * jax.random.normal(ks[9], (D, H), jnp.float32),   # fc2: Linear(emb, hidden)
        'w3': scale * jax.random.normal(ks[10], (H, D), jnp.float32),
        's1': 1.0 + 0.1 * jax.random.normal(ks[11], (1, D), jnp.float32),
        's2': 1.0 + 0.1 * jax.random.normal(ks[12], (1, D), jnp.float32),
    }

    x = jax.random.normal(ks[13], (B, T, D), jnp.float32)

    out = jax.block_until_ready(transformer_pallas(x, params, NH))
    ref = jax.block_until_ready(transformer_ref(x, params, NH))

    assert out.shape == (B, T, D)
    # bf16 matmul operands (f32 accumulation / statistics) -> slightly looser tolerance
    assert jnp.allclose(out, ref, rtol=2e-2, atol=2e-2), \
        f"max abs diff {jnp.max(jnp.abs(out - ref))}"

    print("KERNEL_OK")
</pallas_src>

<mosaic_0001>
module attributes {stable_mosaic.version = 11 : i64} {
  func.func @kernel(%arg0: memref<2x8x64xf32, #tpu.memory_space<vmem>>, %arg1: memref<64x192xbf16, #tpu.memory_space<vmem>>, %arg2: memref<1x192xf32, #tpu.memory_space<vmem>>, %arg3: memref<64x64xbf16, #tpu.memory_space<vmem>>, %arg4: memref<1x64xf32, #tpu.memory_space<vmem>>, %arg5: memref<64x64xbf16, #tpu.memory_space<vmem>>, %arg6: memref<64x64xbf16, #tpu.memory_space<vmem>>, %arg7: memref<64x64xbf16, #tpu.memory_space<vmem>>, %arg8: memref<1x64xf32, #tpu.memory_space<vmem>>, %arg9: memref<1x64xf32, #tpu.memory_space<vmem>>, %arg10: memref<2x8x64xf32, #tpu.memory_space<vmem>>) attributes {dimension_semantics = [], scalar_prefetch = 0 : i64, scratch_operands = 0 : i64, tpu.core_type = #tpu.core_type<tc>} {
    %c0 = arith.constant 0 : index
    %c0_0 = arith.constant 0 : index
    %c0_1 = arith.constant 0 : index
    %0 = vector.load %arg0[%c0, %c0_0, %c0_1] : memref<2x8x64xf32, #tpu.memory_space<vmem>>, vector<2x8x64xf32>
    %1 = vector.shape_cast %0 : vector<2x8x64xf32> to vector<16x64xf32>
    %c0_2 = arith.constant 0 : index
    %c0_3 = arith.constant 0 : index
    %2 = vector.load %arg8[%c0_2, %c0_3] : memref<1x64xf32, #tpu.memory_space<vmem>>, vector<1x64xf32>
    %3 = arith.mulf %1, %1 : vector<16x64xf32>
    %cst = arith.constant dense<0.000000e+00> : vector<16xf32>
    %4 = vector.multi_reduction <add>, %3, %cst [1] : vector<16x64xf32> to vector<16xf32>
    %5 = vector.shape_cast %4 : vector<16xf32> to vector<16x1xf32>
    %cst_4 = arith.constant 6.400000e+01 : f32
    %6 = vector.broadcast %cst_4 : f32 to vector<16x1xf32>
    %7 = arith.divf %5, %6 : vector<16x1xf32>
    %cst_5 = arith.constant 9.99999974E-6 : f32
    %8 = vector.broadcast %cst_5 : f32 to vector<16x1xf32>
    %9 = arith.addf %7, %8 : vector<16x1xf32>
    %10 = math.rsqrt %9 : vector<16x1xf32>
    %11 = vector.broadcast %10 : vector<16x1xf32> to vector<16x64xf32>
    %12 = arith.mulf %1, %11 : vector<16x64xf32>
    %13 = vector.broadcast %2 : vector<1x64xf32> to vector<16x64xf32>
    %14 = arith.mulf %13, %12 : vector<16x64xf32>
    %15 = arith.truncf %14 : vector<16x64xf32> to vector<16x64xbf16>
    %c0_6 = arith.constant 0 : index
    %c0_7 = arith.constant 0 : index
    %16 = vector.load %arg1[%c0_6, %c0_7] : memref<64x192xbf16, #tpu.memory_space<vmem>>, vector<64x192xbf16>
    %cst_8 = arith.constant dense<0.000000e+00> : vector<16x192xf32>
    %17 = tpu.matmul %15, %16, %cst_8 {dimension_numbers = #tpu.dot_dimension_numbers<[1], [0], [0], [1], [0, 0, 1, 1], [], []>} : vector<16x64xbf16>, vector<64x192xbf16>, vector<16x192xf32> -> vector<16x192xf32>
    %c0_9 = arith.constant 0 : index
    %c0_10 = arith.constant 0 : index
    %18 = vector.load %arg2[%c0_9, %c0_10] : memref<1x192xf32, #tpu.memory_space<vmem>>, vector<1x192xf32>
    %19 = vector.broadcast %18 : vector<1x192xf32> to vector<16x192xf32>
    %20 = arith.addf %17, %19 : vector<16x192xf32>
    %21 = vector.extract_strided_slice %20 {offsets = [0, 0], sizes = [16, 64], strides = [1, 1]} : vector<16x192xf32> to vector<16x64xf32>
    %22 = vector.extract_strided_slice %20 {offsets = [0, 64], sizes = [16, 64], strides = [1, 1]} : vector<16x192xf32> to vector<16x64xf32>
    %23 = vector.extract_strided_slice %20 {offsets = [0, 128], sizes = [16, 64], strides = [1, 1]} : vector<16x192xf32> to vector<16x64xf32>
    %c0_11 = arith.constant 0 : index
    %c0_12 = arith.constant 0 : index
    %24 = vector.load %arg3[%c0_11, %c0_12] : memref<64x64xbf16, #tpu.memory_space<vmem>>, vector<64x64xbf16>
    %cst_13 = arith.constant 0.000000e+00 : f32
    %25 = vector.broadcast %cst_13 : f32 to vector<16x64xf32>
    %26 = vector.extract_strided_slice %21 {offsets = [0, 0], sizes = [16, 16], strides = [1, 1]} : vector<16x64xf32> to vector<16x16xf32>
    %27 = vector.shape_cast %26 : vector<16x16xf32> to vector<2x8x16xf32>
    %28 = arith.truncf %27 : vector<2x8x16xf32> to vector<2x8x16xbf16>
    %29 = vector.extract_strided_slice %22 {offsets = [0, 0], sizes = [16, 16], strides = [1, 1]} : vector<16x64xf32> to vector<16x16xf32>
    %30 = vector.shape_cast %29 : vector<16x16xf32> to vector<2x8x16xf32>
    %31 = arith.truncf %30 : vector<2x8x16xf32> to vector<2x8x16xbf16>
    %32 = vector.extract_strided_slice %23 {offsets = [0, 0], sizes = [16, 16], strides = [1, 1]} : vector<16x64xf32> to vector<16x16xf32>
    %33 = vector.shape_cast %32 : vector<16x16xf32> to vector<2x8x16xf32>
    %34 = arith.truncf %33 : vector<2x8x16xf32> to vector<2x8x16xbf16>
    "tpu.trace_start"() <{level = 10 : i32, message = "bqd,bkd->bqk"}> : () -> ()
    %cst_14 = arith.constant dense<0.000000e+00> : vector<2x8x8xf32>
    %35 = tpu.matmul %28, %31, %cst_14 {dimension_numbers = #tpu.dot_dimension_numbers<[2], [2], [1], [1], [0, 0, 0, 1, 1, 1], [0], [0]>} : vector<2x8x16xbf16>, vector<2x8x16xbf16>, vector<2x8x8xf32> -> vector<2x8x8xf32>
    "tpu.trace_stop"() : () -> ()
    %cst_15 = arith.constant 2.500000e-01 : f32
    %36 = vector.broadcast %cst_15 : f32 to vector<2x8x8xf32>
    %37 = arith.mulf %35, %36 : vector<2x8x8xf32>
    %cst_16 = arith.constant dense<0xFF800000> : vector<2x8xf32>
    %38 = vector.multi_reduction <maximumf>, %37, %cst_16 [2] : vector<2x8x8xf32> to vector<2x8xf32>
    %39 = vector.shape_cast %38 : vector<2x8xf32> to vector<2x8x1xf32>
    %40 = vector.broadcast %39 : vector<2x8x1xf32> to vector<2x8x8xf32>
    %41 = arith.subf %37, %40 : vector<2x8x8xf32>
    %42 = math.exp %41 : vector<2x8x8xf32>
    %cst_17 = arith.constant dense<0.000000e+00> : vector<2x8xf32>
    %43 = vector.multi_reduction <add>, %42, %cst_17 [2] : vector<2x8x8xf32> to vector<2x8xf32>
    %44 = vector.shape_cast %43 : vector<2x8xf32> to vector<2x8x1xf32>
    %45 = tpu.reciprocal %44 {approx = true} : vector<2x8x1xf32> -> vector<2x8x1xf32>
    %46 = vector.broadcast %45 : vector<2x8x1xf32> to vector<2x8x8xf32>
    %47 = arith.mulf %42, %46 : vector<2x8x8xf32>
    %48 = arith.truncf %47 : vector<2x8x8xf32> to vector<2x8x8xbf16>
    "tpu.trace_start"() <{level = 10 : i32, message = "bqk,bkd->bqd"}> : () -> ()
    %cst_18 = arith.constant dense<0.000000e+00> : vector<2x8x16xf32>
    %49 = tpu.matmul %48, %34, %cst_18 {dimension_numbers = #tpu.dot_dimension_numbers<[2], [1], [1], [2], [0, 0, 0, 1, 1, 2], [0], [0]>} : vector<2x8x8xbf16>, vector<2x8x16xbf16>, vector<2x8x16xf32> -> vector<2x8x16xf32>
    "tpu.trace_stop"() : () -> ()
    %50 = vector.shape_cast %49 : vector<2x8x16xf32> to vector<16x16xf32>
    %51 = arith.truncf %50 : vector<16x16xf32> to vector<16x16xbf16>
    %52 = vector.extract_strided_slice %24 {offsets = [0, 0], sizes = [16, 64], strides = [1, 1]} : vector<64x64xbf16> to vector<16x64xbf16>
    %cst_19 = arith.constant dense<0.000000e+00> : vector<16x64xf32>
    %53 = tpu.matmul %51, %52, %cst_19 {dimension_numbers = #tpu.dot_dimension_numbers<[1], [0], [0], [1], [0, 0, 1, 1], [], []>} : vector<16x16xbf16>, vector<16x64xbf16>, vector<16x64xf32> -> vector<16x64xf32>
    %54 = arith.addf %25, %53 : vector<16x64xf32>
    %55 = vector.extract_strided_slice %21 {offsets = [0, 16], sizes = [16, 16], strides = [1, 1]} : vector<16x64xf32> to vector<16x16xf32>
    %56 = vector.shape_cast %55 : vector<16x16xf32> to vector<2x8x16xf32>
    %57 = arith.truncf %56 : vector<2x8x16xf32> to vector<2x8x16xbf16>
    %58 = vector.extract_strided_slice %22 {offsets = [0, 16], sizes = [16, 16], strides = [1, 1]} : vector<16x64xf32> to vector<16x16xf32>
    %59 = vector.shape_cast %58 : vector<16x16xf32> to vector<2x8x16xf32>
    %60 = arith.truncf %59 : vector<2x8x16xf32> to vector<2x8x16xbf16>
    %61 = vector.extract_strided_slice %23 {offsets = [0, 16], sizes = [16, 16], strides = [1, 1]} : vector<16x64xf32> to vector<16x16xf32>
    %62 = vector.shape_cast %61 : vector<16x16xf32> to vector<2x8x16xf32>
    %63 = arith.truncf %62 : vector<2x8x16xf32> to vector<2x8x16xbf16>
    "tpu.trace_start"() <{level = 10 : i32, message = "bqd,bkd->bqk"}> : () -> ()
    %cst_20 = arith.constant dense<0.000000e+00> : vector<2x8x8xf32>
    %64 = tpu.matmul %57, %60, %cst_20 {dimension_numbers = #tpu.dot_dimension_numbers<[2], [2], [1], [1], [0, 0, 0, 1, 1, 1], [0], [0]>} : vector<2x8x16xbf16>, vector<2x8x16xbf16>, vector<2x8x8xf32> -> vector<2x8x8xf32>
    "tpu.trace_stop"() : () -> ()
    %cst_21 = arith.constant 2.500000e-01 : f32
    %65 = vector.broadcast %cst_21 : f32 to vector<2x8x8xf32>
    %66 = arith.mulf %64, %65 : vector<2x8x8xf32>
    %cst_22 = arith.constant dense<0xFF800000> : vector<2x8xf32>
    %67 = vector.multi_reduction <maximumf>, %66, %cst_22 [2] : vector<2x8x8xf32> to vector<2x8xf32>
    %68 = vector.shape_cast %67 : vector<2x8xf32> to vector<2x8x1xf32>
    %69 = vector.broadcast %68 : vector<2x8x1xf32> to vector<2x8x8xf32>
    %70 = arith.subf %66, %69 : vector<2x8x8xf32>
    %71 = math.exp %70 : vector<2x8x8xf32>
    %cst_23 = arith.constant dense<0.000000e+00> : vector<2x8xf32>
    %72 = vector.multi_reduction <add>, %71, %cst_23 [2] : vector<2x8x8xf32> to vector<2x8xf32>
    %73 = vector.shape_cast %72 : vector<2x8xf32> to vector<2x8x1xf32>
    %74 = tpu.reciprocal %73 {approx = true} : vector<2x8x1xf32> -> vector<2x8x1xf32>
    %75 = vector.broadcast %74 : vector<2x8x1xf32> to vector<2x8x8xf32>
    %76 = arith.mulf %71, %75 : vector<2x8x8xf32>
    %77 = arith.truncf %76 : vector<2x8x8xf32> to vector<2x8x8xbf16>
    "tpu.trace_start"() <{level = 10 : i32, message = "bqk,bkd->bqd"}> : () -> ()
    %cst_24 = arith.constant dense<0.000000e+00> : vector<2x8x16xf32>
    %78 = tpu.matmul %77, %63, %cst_24 {dimension_numbers = #tpu.dot_dimension_numbers<[2], [1], [1], [2], [0, 0, 0, 1, 1, 2], [0], [0]>} : vector<2x8x8xbf16>, vector<2x8x16xbf16>, vector<2x8x16xf32> -> vector<2x8x16xf32>
    "tpu.trace_stop"() : () -> ()
    %79 = vector.shape_cast %78 : vector<2x8x16xf32> to vector<16x16xf32>
    %80 = arith.truncf %79 : vector<16x16xf32> to vector<16x16xbf16>
    %81 = vector.extract_strided_slice %24 {offsets = [16, 0], sizes = [16, 64], strides = [1, 1]} : vector<64x64xbf16> to vector<16x64xbf16>
    %cst_25 = arith.constant dense<0.000000e+00> : vector<16x64xf32>
    %82 = tpu.matmul %80, %81, %cst_25 {dimension_numbers = #tpu.dot_dimension_numbers<[1], [0], [0], [1], [0, 0, 1, 1], [], []>} : vector<16x16xbf16>, vector<16x64xbf16>, vector<16x64xf32> -> vector<16x64xf32>
    %83 = arith.addf %54, %82 : vector<16x64xf32>
    %84 = vector.extract_strided_slice %21 {offsets = [0, 32], sizes = [16, 16], strides = [1, 1]} : vector<16x64xf32> to vector<16x16xf32>
    %85 = vector.shape_cast %84 : vector<16x16xf32> to vector<2x8x16xf32>
    %86 = arith.truncf %85 : vector<2x8x16xf32> to vector<2x8x16xbf16>
    %87 = vector.extract_strided_slice %22 {offsets = [0, 32], sizes = [16, 16], strides = [1, 1]} : vector<16x64xf32> to vector<16x16xf32>
    %88 = vector.shape_cast %87 : vector<16x16xf32> to vector<2x8x16xf32>
    %89 = arith.truncf %88 : vector<2x8x16xf32> to vector<2x8x16xbf16>
    %90 = vector.extract_strided_slice %23 {offsets = [0, 32], sizes = [16, 16], strides = [1, 1]} : vector<16x64xf32> to vector<16x16xf32>
    %91 = vector.shape_cast %90 : vector<16x16xf32> to vector<2x8x16xf32>
    %92 = arith.truncf %91 : vector<2x8x16xf32> to vector<2x8x16xbf16>
    "tpu.trace_start"() <{level = 10 : i32, message = "bqd,bkd->bqk"}> : () -> ()
    %cst_26 = arith.constant dense<0.000000e+00> : vector<2x8x8xf32>
    %93 = tpu.matmul %86, %89, %cst_26 {dimension_numbers = #tpu.dot_dimension_numbers<[2], [2], [1], [1], [0, 0, 0, 1, 1, 1], [0], [0]>} : vector<2x8x16xbf16>, vector<2x8x16xbf16>, vector<2x8x8xf32> -> vector<2x8x8xf32>
    "tpu.trace_stop"() : () -> ()
    %cst_27 = arith.constant 2.500000e-01 : f32
    %94 = vector.broadcast %cst_27 : f32 to vector<2x8x8xf32>
    %95 = arith.mulf %93, %94 : vector<2x8x8xf32>
    %cst_28 = arith.constant dense<0xFF800000> : vector<2x8xf32>
    %96 = vector.multi_reduction <maximumf>, %95, %cst_28 [2] : vector<2x8x8xf32> to vector<2x8xf32>
    %97 = vector.shape_cast %96 : vector<2x8xf32> to vector<2x8x1xf32>
    %98 = vector.broadcast %97 : vector<2x8x1xf32> to vector<2x8x8xf32>
    %99 = arith.subf %95, %98 : vector<2x8x8xf32>
    %100 = math.exp %99 : vector<2x8x8xf32>
    %cst_29 = arith.constant dense<0.000000e+00> : vector<2x8xf32>
    %101 = vector.multi_reduction <add>, %100, %cst_29 [2] : vector<2x8x8xf32> to vector<2x8xf32>
    %102 = vector.shape_cast %101 : vector<2x8xf32> to vector<2x8x1xf32>
    %103 = tpu.reciprocal %102 {approx = true} : vector<2x8x1xf32> -> vector<2x8x1xf32>
    %104 = vector.broadcast %103 : vector<2x8x1xf32> to vector<2x8x8xf32>
    %105 = arith.mulf %100, %104 : vector<2x8x8xf32>
    %106 = arith.truncf %105 : vector<2x8x8xf32> to vector<2x8x8xbf16>
    "tpu.trace_start"() <{level = 10 : i32, message = "bqk,bkd->bqd"}> : () -> ()
    %cst_30 = arith.constant dense<0.000000e+00> : vector<2x8x16xf32>
    %107 = tpu.matmul %106, %92, %cst_30 {dimension_numbers = #tpu.dot_dimension_numbers<[2], [1], [1], [2], [0, 0, 0, 1, 1, 2], [0], [0]>} : vector<2x8x8xbf16>, vector<2x8x16xbf16>, vector<2x8x16xf32> -> vector<2x8x16xf32>
    "tpu.trace_stop"() : () -> ()
    %108 = vector.shape_cast %107 : vector<2x8x16xf32> to vector<16x16xf32>
    %109 = arith.truncf %108 : vector<16x16xf32> to vector<16x16xbf16>
    %110 = vector.extract_strided_slice %24 {offsets = [32, 0], sizes = [16, 64], strides = [1, 1]} : vector<64x64xbf16> to vector<16x64xbf16>
    %cst_31 = arith.constant dense<0.000000e+00> : vector<16x64xf32>
    %111 = tpu.matmul %109, %110, %cst_31 {dimension_numbers = #tpu.dot_dimension_numbers<[1], [0], [0], [1], [0, 0, 1, 1], [], []>} : vector<16x16xbf16>, vector<16x64xbf16>, vector<16x64xf32> -> vector<16x64xf32>
    %112 = arith.addf %83, %111 : vector<16x64xf32>
    %113 = vector.extract_strided_slice %21 {offsets = [0, 48], sizes = [16, 16], strides = [1, 1]} : vector<16x64xf32> to vector<16x16xf32>
    %114 = vector.shape_cast %113 : vector<16x16xf32> to vector<2x8x16xf32>
    %115 = arith.truncf %114 : vector<2x8x16xf32> to vector<2x8x16xbf16>
    %116 = vector.extract_strided_slice %22 {offsets = [0, 48], sizes = [16, 16], strides = [1, 1]} : vector<16x64xf32> to vector<16x16xf32>
    %117 = vector.shape_cast %116 : vector<16x16xf32> to vector<2x8x16xf32>
    %118 = arith.truncf %117 : vector<2x8x16xf32> to vector<2x8x16xbf16>
    %119 = vector.extract_strided_slice %23 {offsets = [0, 48], sizes = [16, 16], strides = [1, 1]} : vector<16x64xf32> to vector<16x16xf32>
    %120 = vector.shape_cast %119 : vector<16x16xf32> to vector<2x8x16xf32>
    %121 = arith.truncf %120 : vector<2x8x16xf32> to vector<2x8x16xbf16>
    "tpu.trace_start"() <{level = 10 : i32, message = "bqd,bkd->bqk"}> : () -> ()
    %cst_32 = arith.constant dense<0.000000e+00> : vector<2x8x8xf32>
    %122 = tpu.matmul %115, %118, %cst_32 {dimension_numbers = #tpu.dot_dimension_numbers<[2], [2], [1], [1], [0, 0, 0, 1, 1, 1], [0], [0]>} : vector<2x8x16xbf16>, vector<2x8x16xbf16>, vector<2x8x8xf32> -> vector<2x8x8xf32>
    "tpu.trace_stop"() : () -> ()
    %cst_33 = arith.constant 2.500000e-01 : f32
    %123 = vector.broadcast %cst_33 : f32 to vector<2x8x8xf32>
    %124 = arith.mulf %122, %123 : vector<2x8x8xf32>
    %cst_34 = arith.constant dense<0xFF800000> : vector<2x8xf32>
    %125 = vector.multi_reduction <maximumf>, %124, %cst_34 [2] : vector<2x8x8xf32> to vector<2x8xf32>
    %126 = vector.shape_cast %125 : vector<2x8xf32> to vector<2x8x1xf32>
    %127 = vector.broadcast %126 : vector<2x8x1xf32> to vector<2x8x8xf32>
    %128 = arith.subf %124, %127 : vector<2x8x8xf32>
    %129 = math.exp %128 : vector<2x8x8xf32>
    %cst_35 = arith.constant dense<0.000000e+00> : vector<2x8xf32>
    %130 = vector.multi_reduction <add>, %129, %cst_35 [2] : vector<2x8x8xf32> to vector<2x8xf32>
    %131 = vector.shape_cast %130 : vector<2x8xf32> to vector<2x8x1xf32>
    %132 = tpu.reciprocal %131 {approx = true} : vector<2x8x1xf32> -> vector<2x8x1xf32>
    %133 = vector.broadcast %132 : vector<2x8x1xf32> to vector<2x8x8xf32>
    %134 = arith.mulf %129, %133 : vector<2x8x8xf32>
    %135 = arith.truncf %134 : vector<2x8x8xf32> to vector<2x8x8xbf16>
    "tpu.trace_start"() <{level = 10 : i32, message = "bqk,bkd->bqd"}> : () -> ()
    %cst_36 = arith.constant dense<0.000000e+00> : vector<2x8x16xf32>
    %136 = tpu.matmul %135, %121, %cst_36 {dimension_numbers = #tpu.dot_dimension_numbers<[2], [1], [1], [2], [0, 0, 0, 1, 1, 2], [0], [0]>} : vector<2x8x8xbf16>, vector<2x8x16xbf16>, vector<2x8x16xf32> -> vector<2x8x16xf32>
    "tpu.trace_stop"() : () -> ()
    %137 = vector.shape_cast %136 : vector<2x8x16xf32> to vector<16x16xf32>
    %138 = arith.truncf %137 : vector<16x16xf32> to vector<16x16xbf16>
    %139 = vector.extract_strided_slice %24 {offsets = [48, 0], sizes = [16, 64], strides = [1, 1]} : vector<64x64xbf16> to vector<16x64xbf16>
    %cst_37 = arith.constant dense<0.000000e+00> : vector<16x64xf32>
    %140 = tpu.matmul %138, %139, %cst_37 {dimension_numbers = #tpu.dot_dimension_numbers<[1], [0], [0], [1], [0, 0, 1, 1], [], []>} : vector<16x16xbf16>, vector<16x64xbf16>, vector<16x64xf32> -> vector<16x64xf32>
    %141 = arith.addf %112, %140 : vector<16x64xf32>
    %c0_38 = arith.constant 0 : index
    %c0_39 = arith.constant 0 : index
    %142 = vector.load %arg4[%c0_38, %c0_39] : memref<1x64xf32, #tpu.memory_space<vmem>>, vector<1x64xf32>
    %143 = vector.broadcast %142 : vector<1x64xf32> to vector<16x64xf32>
    %144 = arith.addf %141, %143 : vector<16x64xf32>
    %145 = arith.addf %1, %144 : vector<16x64xf32>
    %c0_40 = arith.constant 0 : index
    %c0_41 = arith.constant 0 : index
    %146 = vector.load %arg9[%c0_40, %c0_41] : memref<1x64xf32, #tpu.memory_space<vmem>>, vector<1x64xf32>
    %147 = arith.mulf %145, %145 : vector<16x64xf32>
    %cst_42 = arith.constant dense<0.000000e+00> : vector<16xf32>
    %148 = vector.multi_reduction <add>, %147, %cst_42 [1] : vector<16x64xf32> to vector<16xf32>
    %149 = vector.shape_cast %148 : vector<16xf32> to vector<16x1xf32>
    %cst_43 = arith.constant 6.400000e+01 : f32
    %150 = vector.broadcast %cst_43 : f32 to vector<16x1xf32>
    %151 = arith.divf %149, %150 : vector<16x1xf32>
    %cst_44 = arith.constant 9.99999974E-6 : f32
    %152 = vector.broadcast %cst_44 : f32 to vector<16x1xf32>
    %153 = arith.addf %151, %152 : vector<16x1xf32>
    %154 = math.rsqrt %153 : vector<16x1xf32>
    %155 = vector.broadcast %154 : vector<16x1xf32> to vector<16x64xf32>
    %156 = arith.mulf %145, %155 : vector<16x64xf32>
    %157 = vector.broadcast %146 : vector<1x64xf32> to vector<16x64xf32>
    %158 = arith.mulf %157, %156 : vector<16x64xf32>
    %159 = arith.truncf %158 : vector<16x64xf32> to vector<16x64xbf16>
    %c0_45 = arith.constant 0 : index
    %c0_46 = arith.constant 0 : index
    %160 = vector.load %arg5[%c0_45, %c0_46] : memref<64x64xbf16, #tpu.memory_space<vmem>>, vector<64x64xbf16>
    %cst_47 = arith.constant dense<0.000000e+00> : vector<16x64xf32>
    %161 = tpu.matmul %159, %160, %cst_47 {dimension_numbers = #tpu.dot_dimension_numbers<[1], [0], [0], [1], [0, 0, 1, 1], [], []>} : vector<16x64xbf16>, vector<64x64xbf16>, vector<16x64xf32> -> vector<16x64xf32>
    %162 = arith.truncf %161 : vector<16x64xf32> to vector<16x64xbf16>
    %c0_48 = arith.constant 0 : index
    %c0_49 = arith.constant 0 : index
    %163 = vector.load %arg6[%c0_48, %c0_49] : memref<64x64xbf16, #tpu.memory_space<vmem>>, vector<64x64xbf16>
    %cst_50 = arith.constant dense<0.000000e+00> : vector<16x64xf32>
    %164 = tpu.matmul %162, %163, %cst_50 {dimension_numbers = #tpu.dot_dimension_numbers<[1], [0], [0], [1], [0, 0, 1, 1], [], []>} : vector<16x64xbf16>, vector<64x64xbf16>, vector<16x64xf32> -> vector<16x64xf32>
    %165 = arith.negf %161 : vector<16x64xf32>
    %166 = math.exp %165 : vector<16x64xf32>
    %cst_51 = arith.constant 1.000000e+00 : f32
    %167 = vector.broadcast %cst_51 : f32 to vector<16x64xf32>
    %168 = arith.addf %167, %166 : vector<16x64xf32>
    %169 = arith.divf %167, %168 : vector<16x64xf32>
    %170 = arith.mulf %161, %169 : vector<16x64xf32>
    %171 = arith.mulf %170, %164 : vector<16x64xf32>
    %172 = arith.truncf %171 : vector<16x64xf32> to vector<16x64xbf16>
    %c0_52 = arith.constant 0 : index
    %c0_53 = arith.constant 0 : index
    %173 = vector.load %arg7[%c0_52, %c0_53] : memref<64x64xbf16, #tpu.memory_space<vmem>>, vector<64x64xbf16>
    %cst_54 = arith.constant dense<0.000000e+00> : vector<16x64xf32>
    %174 = tpu.matmul %172, %173, %cst_54 {dimension_numbers = #tpu.dot_dimension_numbers<[1], [0], [0], [1], [0, 0, 1, 1], [], []>} : vector<16x64xbf16>, vector<64x64xbf16>, vector<16x64xf32> -> vector<16x64xf32>
    %175 = arith.addf %174, %1 : vector<16x64xf32>
    %176 = vector.shape_cast %175 : vector<16x64xf32> to vector<2x8x64xf32>
    %c0_55 = arith.constant 0 : index
    %c0_56 = arith.constant 0 : index
    %c0_57 = arith.constant 0 : index
    %177 = vector.load %arg10[%c0_55, %c0_56, %c0_57] : memref<2x8x64xf32, #tpu.memory_space<vmem>>, vector<2x8x64xf32>
    tpu.vector_store %arg10[%c0_55, %c0_56, %c0_57], %176 {strides = array<i32>} : memref<2x8x64xf32, #tpu.memory_space<vmem>>, vector<2x8x64xf32>,
    return
  }
}

</mosaic_0001>

<bundles_post_ra>
// kernel: transformer_pallas.1
= control target key start
LH: loop header
LB: loop body
LE: loop exit
PB: predicated region body
PF: predicated region fallthrough
CT: control target
= control target key end

     0   :  { %vm42_vm0 = vcmask 523264   ;;  %s1569_s0 = inlined_call_operand.vmem [shape: f32[2,8,64], index: 0, kind: input, shape index: {}]   ;;  %s1570_s1 = inlined_call_operand.vmem [shape: bf16[64,192], index: 1, kind: input, shape index: {}]   ;;  %s1571_s2 = inlined_call_operand.vmem [shape: f32[1,192], index: 2, kind: input, shape index: {}]   ;;  %s1572_s3 = inlined_call_operand.vmem [shape: bf16[64,64], index: 3, kind: input, shape index: {}]   ;;  %s1573_s4 = inlined_call_operand.vmem [shape: f32[1,64], index: 4, kind: input, shape index: {}]   ;;  %s1574_s5 = inlined_call_operand.vmem [shape: bf16[64,64], index: 5, kind: input, shape index: {}]   ;;  %s1575_s6 = inlined_call_operand.vmem [shape: bf16[64,64], index: 6, kind: input, shape index: {}]   ;;  %s1576_s7 = inlined_call_operand.vmem [shape: bf16[64,64], index: 7, kind: input, shape index: {}]   ;;  %s1577_s8 = inlined_call_operand.vmem [shape: f32[1,64], index: 8, kind: input, shape index: {}]   ;;  %s1578_s9 = inlined_call_operand.vmem [shape: f32[1,64], index: 9, kind: input, shape index: {}]   ;;  %s1579_s10 = inlined_call_operand.hbm [shape: f32[2,8,64], index: 10, kind: output, shape index: {}]  }
   0x1   :  { %v1316_v0 = vld [vmem:[%s1569_s0] sm:$0xff] }
   0x2   :  { %v40_v1 = vmul.f32 %v1316_v0, %v1316_v0 }
   0x3   :  { %15 = vsyncpa [#allocation3], 0  ;;  %v1323_v2 = vld [vmem:[%s1569_s0 + $0x8] sm:$0xff]  ;;  %v1247_v6 = vmov 64.0   ;;  %v1034_v10 = vld [vmem:[%s1570_s1 + $0x30] sm:$0xf] }
   0x4   :  { %v43_v3 = vsel %vm42_vm0, %v40_v1, 0.0  ;;  %v41_v4 = vmul.f32 %v1323_v2, %v1323_v2  ;;  %1169 = vrcp.f32 %v1247_v6  ;;  %v1138_v11 = vld [vmem:[%s1570_s1 + $0x34] sm:$0xf0]  ;;  %v1137_v12 = vld [vmem:[%s1570_s1 + $0x34] sm:$0xf]  ;;  %s1249_s12 = smov 64  }
   0x5   :  { %44 = vadd.xlane.f32.xlu0 %v43_v3  ;;  %v1035_v13 = vor.u32 %v1138_v11, %v1034_v10  ;;  %v1036_v14 = vld [vmem:[%s1570_s1 + $0x38] sm:$0xf0]  ;;  %v1026_v17 = vld [vmem:[%s1570_s1 + $0x20] sm:$0xf]  ;;  %v1136_v18 = vld [vmem:[%s1570_s1 + $0x24] sm:$0xf0] }
   0x6   :  { %v46_v5 = vsel %vm42_vm0, %v41_v4, 0.0  ;;  %v1039_v15 = vor.u32 %v1137_v12, %v1036_v14  ;;  %v1135_v19 = vld [vmem:[%s1570_s1 + $0x24] sm:$0xf]  ;;  %v1027_v20 = vor.u32 %v1136_v18, %v1026_v17  ;;  %v1028_v21 = vld [vmem:[%s1570_s1 + $0x28] sm:$0xf0]  ;;  %vm190_vm8 = vcmask 130048  }
   0x7   :  { %149 = vmatpush.bf16.msra.mxu0 %v1035_v13  ;;  %v1031_v22 = vor.u32 %v1135_v19, %v1028_v21  ;;  %v1018_v24 = vld [vmem:[%s1570_s1 + $0x10] sm:$0xf]  ;;  %v1134_v25 = vld [vmem:[%s1570_s1 + $0x14] sm:$0xf0]  ;;  %v1133_v26 = vld [vmem:[%s1570_s1 + $0x14] sm:$0xf] }
   0x8   :  { %163 = vmatpush.bf16.msra.mxu1 %v1039_v15  ;;  %v1019_v27 = vor.u32 %v1134_v25, %v1018_v24  ;;  %v1020_v28 = vld [vmem:[%s1570_s1 + $0x18] sm:$0xf0]  ;;  %v1010_v31 = vld [vmem:[%s1570_s1] sm:$0xf]  ;;  %v1132_v32 = vld [vmem:[%s1570_s1 + $0x4] sm:$0xf0] }
   0x9   :  { %v1023_v29 = vor.u32 %v1133_v26, %v1020_v28  ;;  %v1131_v33 = vld [vmem:[%s1570_s1 + $0x4] sm:$0xf]  ;;  %v1011_v34 = vor.u32 %v1132_v32, %v1010_v31  ;;  %v1012_v35 = vld [vmem:[%s1570_s1 + $0x8] sm:$0xf0]  ;;  %v1166_v57 = vld [vmem:[%s1577_s8] ss:$0 sm:$0xff] }
   0xa   :  { %v1170_v7 = vpop.eup %1169  ;;  %v1015_v37 = vor.u32 %v1131_v33, %v1012_v35  ;;  %v96_v63 = vld [vmem:[%s1571_s2] sm:$0x3]  ;;  %s1248_s8 = smov 112   ;;  %s1250_s2 = smov 48   ;;  %vm264_vm9 = vcmask 1043456   ;;  %vm236_vm10 = vcmask 64512  }
   0xb   :  { %v50_v8 = vmul.f32 64.0, %v1170_v7  ;;  %150 = vmatpush.bf16.msra.mxu0 %v1027_v20  ;;  %vm54_vm1 = vweird.f32 %v1170_v7  ;;  %v98_v1 = vperm.slane %v96_v63, 0  ;;  %v99_v15 = vperm.slane %v96_v63, 1  ;;  %s1251_s13 = smov 32   ;;  %s1252_s14 = smov 96  }
   0xc   :  { %164 = vmatpush.bf16.msra.mxu1 %v1031_v22  ;;  %s1253_s15 = smov 16   ;;  %s1254_s16 = smov 80  }
   0xd   :  { %47 = vadd.xlane.f32.xlu0 %v46_v5  ;;  %v51_v9 = vsub.f32 1.0, %v50_v8  ;;  %s1255_s26 = smov [#allocation2]   ;;  %s996_s28 = sshll.u32 %s1579_s10, 4  ;;  %s997_s28 = int_to_ptr.hbm [resolvable:$true] %s996_s28 }
   0xe   :  { %s1256_s30 = smov 128   ;;  %s1257_s11 = smov 8  }
   0xf   :  { %v52_v16 = vmul.f32 %v1170_v7, %v51_v9  ;;  %151 = vmatpush.bf16.msra.mxu0 %v1019_v27 }
  0x10   :  { %165 = vmatpush.bf16.msra.mxu1 %v1023_v29 }
  0x11   :  { %v53_v23 = vadd.f32 %v1170_v7, %v52_v16 }
  0x13   :  { %v1365_v30 = vsel %vm54_vm1, %v1170_v7, %v53_v23  ;;  %152 = vmatpush.bf16.msra.mxu0 %v1011_v34 }
  0x14   :  { %166 = vmatpush.bf16.msra.mxu1 %v1015_v37 }
  0x78   :  { %v45_v36 = vpop.xlane.xlu0 %44 }
  0x79   :  { %v56_v38 = vmul.f32 %v1365_v30, %v45_v36 }
  0x7b   :  { %v58_v39 = vadd.f32 1e-05, %v56_v38 }
  0x7d   :  { %1171 = vrsqrt.f32 %v58_v39  ;;  %vm66_vm3 = vweird.f32 %v58_v39 }
  0x80   :  { %v48_v40 = vpop.xlane.xlu0 %47 }
  0x81   :  { %v57_v41 = vmul.f32 %v1365_v30, %v48_v40 }
  0x83   :  { %v1172_v42 = vpop.eup %1171  ;;  %v59_v43 = vadd.f32 1e-05, %v57_v41 }
  0x84   :  { %v61_v44 = vmul.f32 %v1172_v42, %v58_v39  ;;  %vm67_vm2 = vweird.f32 %v1172_v42 }
  0x85   :  { %1173 = vrsqrt.f32 %v59_v43  ;;  %vm68_vm4 = vmor %vm66_vm3, %vm67_vm2  ;;  %vm76_vm6 = vweird.f32 %v59_v43 }
  0x86   :  { %v62_v45 = vmul.f32 %v1172_v42, %v61_v44 }
  0x88   :  { %v63_v46 = vmul.f32 0.5, %v62_v45 }
  0x8a   :  { %v64_v47 = vsub.f32 1.5, %v63_v46 }
  0x8b   :  { %v1174_v48 = vpop.eup %1173 }
  0x8c   :  { %v71_v49 = vmul.f32 %v1174_v48, %v59_v43  ;;  %v65_v50 = vmul.f32 %v1172_v42, %v64_v47  ;;  %vm77_vm5 = vweird.f32 %v1174_v48 }
  0x8d   :  { %vm78_vm7 = vmor %vm76_vm6, %vm77_vm5 }
  0x8e   :  { %v72_v51 = vmul.f32 %v1174_v48, %v71_v49  ;;  %v69_v53 = vsel %vm68_vm4, %v1172_v42, %v65_v50 }
  0x8f   :  { %v80_v56 = vmul.f32 %v69_v53, %v1316_v0 }
  0x90   :  { %v73_v52 = vmul.f32 0.5, %v72_v51 }
  0x91   :  { %v85_v60 = vmul.f32 %v1166_v57, %v80_v56 }
  0x92   :  { %v74_v54 = vsub.f32 1.5, %v73_v52 }
  0x94   :  { %v75_v55 = vmul.f32 %v1174_v48, %v74_v54 }
  0x96   :  { %v79_v58 = vsel %vm78_vm7, %v1174_v48, %v75_v55 }
  0x97   :  { %v81_v59 = vmul.f32 %v79_v58, %v1323_v2 }
  0x99   :  { %v86_v61 = vmul.f32 %v1166_v57, %v81_v59 }
  0x9b   :  { %v87_v62 = vpack.c.bf16 %v86_v61, %v85_v60 }
  0x9d   :  { %1040 = vmatmul.msk.bf16.vlgmr.msra.gmra.mxu0 %vm42_vm0, %v87_v62  ;;  %1041 = vmatmul.msk.bf16.vlgmr.msra.gmra.mxu1 %vm42_vm0, %v87_v62 }
 0x11a   :  { %v154_v3 = vpop.f32.mrf.mxu0  ;;  %v168_v13 = vpop.f32.mrf.mxu1 }
 0x11b   :  { %v155_v4 = vadd.f32 %v154_v3, %v98_v1  ;;  %v169_v22 = vadd.f32 %v168_v13, %v99_v15 }
 0x11d   :  { %v181_v5 = vpack.c.bf16 %v155_v4, %v155_v4  ;;  %v183_v23 = vpack.c.bf16 %v169_v22, %v169_v22 }
 0x11f   :  { %v186_v6 = vunpack.c.l.b16 %v181_v5  ;;  %v266_v26 = vsel %vm264_vm9, %v183_v23, 0  ;;  %v374_v59 = vunpack.c.l.b16 %v183_v23  ;;  %v1140_v23 = vld [vmem:[%s1572_s3 + $0x8] sm:$0xff] }
 0x121   :  { %v1391_v7 = vpack.c.b16 %v186_v6, %v186_v6  ;;  %v1426_v60 = vpack.c.b16 %v374_v59, %v374_v59 }
 0x122   :  { %v156_v8 = vpop.f32.mrf.mxu0  ;;  %v170_v14 = vpop.f32.mrf.mxu1 }
 0x123   :  { %v157_v9 = vadd.f32 %v156_v8, %v98_v1  ;;  %301 = vrot.lane.b32.xlu2 %v1391_v7, %s1248_s8  ;;  %188 = vrot.lane.b32.xlu1 %v1391_v7, %s1249_s12  ;;  %v171_v17 = vadd.f32 %v170_v14, %v99_v15 }
 0x125   :  { %v182_v10 = vpack.c.bf16 %v157_v9, %v157_v9  ;;  %v184_v18 = vpack.c.bf16 %v171_v17, %v171_v17 }
 0x127   :  { %v211_v11 = vunpack.c.l.b16 %v182_v10  ;;  %v285_v21 = vsel %vm264_vm9, %v184_v18, 0  ;;  %v398_v47 = vunpack.c.l.b16 %v184_v18 }
 0x129   :  { %v1396_v12 = vpack.c.b16 %v211_v11, %v211_v11  ;;  %v1418_v48 = vpack.c.b16 %v398_v47, %v398_v47 }
 0x12b   :  { %326 = vrot.lane.b32.xlu0 %v1396_v12, %s1250_s2  ;;  %213 = vrot.lane.b32.xlu2 %v1396_v12, %s1249_s12 }
 0x12c   :  { %303 = vrot.lane.b32.xlu1 %v1391_v7, %s1250_s2 }
 0x134   :  { %324 = vrot.lane.b32.xlu1 %v1396_v12, %s1248_s8 }
 0x17d   :  { %v302_v16 = vpop.permute.xlu2 %301 }
 0x185   :  { %v214_v19 = vpop.permute.xlu2 %213 }
 0x186   :  { %v219_v20 = vsel %vm190_vm8, %v214_v19, 0 }
 0x187   :  { %228 = vmatpush.bf16.xpose.msra.mxu3 %v219_v20 }
 0x18e   :  { %1043 = vmatmul.msk.bf16.vlgmr.msra.gmra.mxu3 %vm190_vm8, %v182_v10 }
 0x18f   :  { %294 = vmatpush.bf16.msrb.mxu3 %v285_v21 }
 0x195   :  { %v189_v24 = vpop.permute.xlu1 %188 }
 0x196   :  { %v195_v25 = vsel %vm190_vm8, %v189_v24, 0 }
 0x197   :  { %204 = vmatpush.bf16.xpose.msra.mxu2 %v195_v25 }
 0x19d   :  { %v327_v27 = vpop.permute.xlu0 %326 }
 0x19e   :  { %v304_v28 = vpop.permute.xlu1 %303  ;;  %1042 = vmatmul.msk.bf16.vlgmr.msra.gmra.mxu2 %vm190_vm8, %v181_v5  ;;  %v332_v29 = vsel %vm190_vm8, %v327_v27, 0 }
 0x19f   :  { %275 = vmatpush.bf16.msrb.mxu2 %v266_v26  ;;  %v309_v31 = vsel %vm190_vm8, %v304_v28, 0  ;;  %341 = vmatpush.bf16.xpose.msrb.mxu1 %v332_v29 }
 0x1a0   :  { %318 = vmatpush.bf16.xpose.msrb.mxu0 %v309_v31 }
 0x1a6   :  { %v325_v32 = vpop.permute.xlu1 %324 }
 0x1a7   :  { %1046 = vmatmul.msk.bf16.vlgmr.msrb.gmra.mxu0 %vm190_vm8, %v302_v16  ;;  %1047 = vmatmul.msk.bf16.vlgmr.msrb.gmra.mxu1 %vm190_vm8, %v325_v32 }
 0x1a8   :  { %438 = vmatpush.bf16.msra.mxu0 %v1140_v23 }
 0x211   :  { %v230_v33 = vpop.f32.mrf.mxu3 }
 0x212   :  { %v235_v3 = vmul.f32 0.25, %v230_v33  ;;  %v1139_v33 = vld [vmem:[%s1572_s3] sm:$0xff] }
 0x213   :  { %461 = vmatpush.bf16.msra.mxu1 %v1139_v33 }
 0x214   :  { %v240_v4 = vsel %vm236_vm10, %v235_v3, -inf }
 0x219   :  { %v232_v34 = vpop.f32.mrf.mxu3 }
 0x221   :  { %v206_v35 = vpop.f32.mrf.mxu2 }
 0x222   :  { %v234_v36 = vmul.f32 0.25, %v206_v35 }
 0x224   :  { %v320_v37 = vpop.f32.mrf.mxu0  ;;  %v343_v38 = vpop.f32.mrf.mxu1  ;;  %v237_v39 = vsel %vm236_vm10, %v234_v36, -inf }
 0x225   :  { %v347_v40 = vmul.f32 0.25, %v320_v37  ;;  %238 = vmax.xlane.f32.xlu2 %v237_v39  ;;  %v348_v45 = vmul.f32 0.25, %v343_v38 }
 0x227   :  { %v349_v41 = vsel %vm236_vm10, %v347_v40, -inf  ;;  %v352_v46 = vsel %vm236_vm10, %v348_v45, -inf }
 0x228   :  { %350 = vmax.xlane.f32.xlu1 %v349_v41 }
 0x229   :  { %v208_v42 = vpop.f32.mrf.mxu2 }
 0x22c   :  { %v322_v43 = vpop.f32.mrf.mxu0  ;;  %v345_v44 = vpop.f32.mrf.mxu1 }
 0x241   :  { %470 = vrot.lane.b32.xlu1 %v1391_v7, %s1251_s13 }
 0x26b   :  { %353 = vmax.xlane.f32.xlu1 %v352_v46 }
 0x284   :  { %400 = vrot.lane.b32.xlu1 %v1418_v48, %s1248_s8 }
 0x298   :  { %v239_v49 = vpop.xlane.xlu2 %238 }
 0x299   :  { %v243_v50 = vsub.f32 %v234_v36, %v239_v49 }
 0x29b   :  { %v245_v51 = vmul.f32 1.442695, %v243_v50  ;;  %v351_v52 = vpop.xlane.xlu1 %350 }
 0x29c   :  { %v355_v53 = vsub.f32 %v347_v40, %v351_v52 }
 0x29d   :  { %1175 = vpow2.f32 %v245_v51 }
 0x29e   :  { %v357_v54 = vmul.f32 1.442695, %v355_v53 }
 0x2a0   :  { %1177 = vpow2.f32 %v357_v54 }
 0x2a3   :  { %v1176_v55 = vpop.eup %1175 }
 0x2a4   :  { %v249_v56 = vsel %vm236_vm10, %v1176_v55, 0.0 }
 0x2a5   :  { %250 = vadd.xlane.f32.xlu0 %v249_v56 }
 0x2a6   :  { %v1178_v57 = vpop.eup %1177 }
 0x2a7   :  { %v361_v58 = vsel %vm236_vm10, %v1178_v57, 0.0 }
 0x2a8   :  { %362 = vadd.xlane.f32.xlu2 %v361_v58 }
 0x2b3   :  { %v471_v61 = vpop.permute.xlu1 %470 }
 0x2b4   :  { %v476_v18 = vsel %vm190_vm8, %v471_v61, 0 }
 0x2b9   :  { %468 = vrot.lane.b32.xlu0 %v1391_v7, %s1252_s14 }
 0x2c0   :  { %376 = vrot.lane.b32.xlu2 %v1426_v60, %s1248_s8 }
 0x2de   :  { %v354_v62 = vpop.xlane.xlu1 %353 }
 0x2df   :  { %v356_v63 = vsub.f32 %v348_v45, %v354_v62 }
 0x2e1   :  { %v359_v1 = vmul.f32 1.442695, %v356_v63 }
 0x2e3   :  { %1179 = vpow2.f32 %v359_v1 }
 0x2e9   :  { %241 = vmax.xlane.f32.xlu2 %v240_v4  ;;  %v1431_v5 = vpop.eup %1179 }
 0x2ea   :  { %v364_v6 = vsel %vm236_vm10, %v1431_v5, 0.0 }
 0x2f1   :  { %365 = vadd.xlane.f32.xlu2 %v364_v6 }
 0x2f6   :  { %v401_v8 = vpop.permute.xlu1 %400 }
 0x2f7   :  { %v406_v9 = vsel %vm264_vm9, %v401_v8, 0 }
 0x2f8   :  { %415 = vmatpush.bf16.msra.mxu3 %v406_v9 }
 0x309   :  { %493 = vrot.lane.b32.xlu2 %v1396_v12, %s1251_s13 }
 0x311   :  { %540 = vrot.lane.b32.xlu2 %v1426_v60, %s1252_s14 }
 0x318   :  { %v251_v10 = vpop.xlane.xlu0 %250 }
 0x319   :  { %1181 = vrcp.f32 %v251_v10  ;;  %610 = vrot.lane.b32.xlu2 %v1391_v7, %s1253_s15 }
 0x31b   :  { %v363_v11 = vpop.xlane.xlu2 %362 }
 0x31c   :  { %1183 = vrcp.f32 %v363_v11 }
 0x31f   :  { %v1182_v13 = vpop.eup %1181 }
 0x320   :  { %v257_v14 = vmul.f32 %v1182_v13, %v1176_v55 }
 0x321   :  { %633 = vrot.lane.b32.xlu2 %v1396_v12, %s1253_s15 }
 0x322   :  { %v259_v15 = vpack.c.bf16 %v257_v14, %v257_v14  ;;  %v1184_v19 = vpop.eup %1183 }
 0x323   :  { %v377_v16 = vpop.permute.xlu2 %376  ;;  %v369_v20 = vmul.f32 %v1184_v19, %v1178_v57 }
 0x324   :  { %v382_v17 = vsel %vm264_vm9, %v377_v16, 0  ;;  %1044 = vmatmul.msk.bf16.vlgmr.msrb.gmra.mxu2 %vm236_vm10, %v259_v15 }
 0x325   :  { %391 = vmatpush.bf16.msra.mxu2 %v382_v17  ;;  %v371_v21 = vpack.c.bf16 %v369_v20, %v369_v20 }
 0x329   :  { %485 = vmatpush.bf16.xpose.msrb.mxu2 %v476_v18  ;;  %608 = vrot.lane.b32.xlu2 %v1391_v7, %s1254_s16 }
 0x32b   :  { %v469_v22 = vpop.permute.xlu0 %468 }
 0x331   :  { %631 = vrot.lane.b32.xlu2 %v1396_v12, %s1254_s16 }
 0x334   :  { %1048 = vmatmul.msk.bf16.vlgmr.msra.gmra.mxu2 %vm236_vm10, %v371_v21 }
 0x339   :  { %561 = vrot.lane.b32.xlu2 %v1418_v48, %s1252_s14 }
 0x344   :  { %1060 = vmatmul.msk.bf16.vlgmr.msrb.gmra.mxu2 %vm190_vm8, %v469_v22 }
 0x35c   :  { %v242_v7 = vpop.xlane.xlu2 %241 }
 0x35d   :  { %v244_v24 = vsub.f32 %v235_v3, %v242_v7 }
 0x35f   :  { %v247_v25 = vmul.f32 1.442695, %v244_v24 }
 0x361   :  { %1185 = vpow2.f32 %v247_v25 }
 0x364   :  { %v366_v26 = vpop.xlane.xlu2 %365 }
 0x367   :  { %v1186_v27 = vpop.eup %1185 }
 0x368   :  { %v252_v28 = vsel %vm236_vm10, %v1186_v27, 0.0 }
 0x369   :  { %253 = vadd.xlane.f32.xlu0 %v252_v28 }
 0x36c   :  { %v494_v29 = vpop.permute.xlu2 %493 }
 0x36d   :  { %v499_v52 = vsel %vm190_vm8, %v494_v29, 0 }
 0x374   :  { %v541_v31 = vpop.permute.xlu2 %540 }
 0x375   :  { %v546_v32 = vsel %vm264_vm9, %v541_v31, 0 }
 0x376   :  { %555 = vmatpush.bf16.msrb.mxu0 %v546_v32 }
 0x37c   :  { %v611_v34 = vpop.permute.xlu2 %610 }
 0x37d   :  { %491 = vrot.lane.b32.xlu0 %v1396_v12, %s1252_s14  ;;  %v616_v56 = vsel %vm190_vm8, %v611_v34, 0 }
 0x384   :  { %v634_v35 = vpop.permute.xlu2 %633 }
 0x385   :  { %v639_v8 = vsel %vm190_vm8, %v634_v35, 0 }
 0x38c   :  { %v609_v36 = vpop.permute.xlu2 %608 }
 0x394   :  { %v632_v37 = vpop.permute.xlu2 %631 }
 0x39c   :  { %v562_v38 = vpop.permute.xlu2 %561 }
 0x39d   :  { %v567_v39 = vsel %vm264_vm9, %v562_v38, 0  ;;  %v1141_v38 = vld [vmem:[%s1572_s3 + $0x10] sm:$0xff] }
 0x39e   :  { %576 = vmatpush.bf16.msrb.mxu1 %v567_v39  ;;  %599 = vmatpush.bf16.msra.mxu2 %v1141_v38  ;;  %v1149_v38 = vld [vmem:[%s1575_s6 + $0x10] sm:$0xff] }
 0x3a7   :  { %v277_v40 = vpop.f32.mrf.mxu2 }
 0x3af   :  { %v279_v41 = vpop.f32.mrf.mxu2 }
 0x3b7   :  { %v393_v42 = vpop.f32.mrf.mxu2 }
 0x3bf   :  { %v395_v43 = vpop.f32.mrf.mxu2 }
 0x3c7   :  { %v487_v44 = vpop.f32.mrf.mxu2 }
 0x3c8   :  { %v514_v45 = vmul.f32 0.25, %v487_v44 }
 0x3ca   :  { %v516_v46 = vsel %vm236_vm10, %v514_v45, -inf }
 0x3cb   :  { %517 = vmax.xlane.f32.xlu1 %v516_v46 }
 0x3cf   :  { %v489_v47 = vpop.f32.mrf.mxu2 }
 0x3dc   :  { %v254_v49 = vpop.xlane.xlu0 %253 }
 0x3dd   :  { %1187 = vrcp.f32 %v254_v49 }
 0x3de   :  { %1189 = vrcp.f32 %v366_v26 }
 0x3e3   :  { %v1188_v12 = vpop.eup %1187 }
 0x3e4   :  { %v258_v50 = vmul.f32 %v1188_v12, %v1186_v27  ;;  %v1190_v53 = vpop.eup %1189 }
 0x3e5   :  { %v370_v54 = vmul.f32 %v1190_v53, %v1431_v5 }
 0x3e6   :  { %v260_v51 = vpack.c.bf16 %v258_v50, %v258_v50 }
 0x3e7   :  { %v372_v55 = vpack.c.bf16 %v370_v54, %v370_v54 }
 0x3e8   :  { %1045 = vmatmul.msk.bf16.vlgmr.msrb.gmra.mxu3 %vm236_vm10, %v260_v51 }
 0x3e9   :  { %508 = vmatpush.bf16.xpose.msrb.mxu3 %v499_v52 }
 0x3ef   :  { %v492_v57 = vpop.permute.xlu0 %491 }
 0x3f8   :  { %1049 = vmatmul.msk.bf16.vlgmr.msra.gmra.mxu3 %vm236_vm10, %v372_v55 }
 0x3f9   :  { %625 = vmatpush.bf16.xpose.msra.mxu3 %v616_v56 }
 0x408   :  { %1061 = vmatmul.msk.bf16.vlgmr.msrb.gmra.mxu3 %vm190_vm8, %v492_v57 }
 0x418   :  { %1069 = vmatmul.msk.bf16.vlgmr.msra.gmra.mxu3 %vm190_vm8, %v609_v36 }
 0x43e   :  { %v518_v58 = vpop.xlane.xlu1 %517 }
 0x43f   :  { %v522_v59 = vsub.f32 %v514_v45, %v518_v58 }
 0x441   :  { %v524_v61 = vmul.f32 1.442695, %v522_v59 }
 0x443   :  { %1191 = vpow2.f32 %v524_v61 }
 0x449   :  { %v1192_v62 = vpop.eup %1191 }
 0x44a   :  { %v528_v63 = vsel %vm236_vm10, %v1192_v62, 0.0 }
 0x44b   :  { %529 = vadd.xlane.f32.xlu0 %v528_v63 }
 0x46b   :  { %v296_v1 = vpop.f32.mrf.mxu3 }
 0x46c   :  { %v300_v3 = vpack.c.bf16 %v296_v1, %v277_v40 }
 0x46e   :  { %1059 = vmatmul.msk.bf16.vlgmr.msra.gmra.mxu1 %vm190_vm8, %v300_v3 }
 0x473   :  { %v298_v4 = vpop.f32.mrf.mxu3 }
 0x47b   :  { %v417_v5 = vpop.f32.mrf.mxu3 }
 0x47c   :  { %v421_v6 = vpack.c.bf16 %v417_v5, %v393_v42 }
 0x47e   :  { %1054 = vmatmul.msk.bf16.vlgmr.msra.gmra.mxu0 %vm190_vm8, %v421_v6  ;;  %v1142_v6 = vld [vmem:[%s1572_s3 + $0x18] sm:$0xff]  ;;  %s994_s3 = sshll.u32 %s1255_s26, 4  ;;  %s995_s3 = int_to_ptr.vmem [resolvable:$true] %s994_s3 }
 0x47f   :  { %648 = vmatpush.bf16.xpose.msra.mxu0 %v639_v8  ;;  %739 = vmatpush.bf16.msrb.mxu3 %v1142_v6 }
 0x483   :  { %v419_v9 = vpop.f32.mrf.mxu3 }
 0x48b   :  { %v510_v10 = vpop.f32.mrf.mxu3 }
 0x48c   :  { %v515_v11 = vmul.f32 0.25, %v510_v10 }
 0x48e   :  { %v519_v13 = vsel %vm236_vm10, %v515_v11, -inf }
 0x48f   :  { %520 = vmax.xlane.f32.xlu1 %v519_v13 }
 0x493   :  { %v512_v14 = vpop.f32.mrf.mxu3 }
 0x49b   :  { %v627_v15 = vpop.f32.mrf.mxu3 }
 0x49c   :  { %v654_v28 = vmul.f32 0.25, %v627_v15 }
 0x49e   :  { %v656_v29 = vsel %vm236_vm10, %v654_v28, -inf }
 0x4a3   :  { %v629_v16 = vpop.f32.mrf.mxu3 }
 0x4be   :  { %v530_v17 = vpop.xlane.xlu0 %529 }
 0x4bf   :  { %1193 = vrcp.f32 %v530_v17  ;;  %v1167_v17 = vld [vmem:[%s1573_s4] ss:$0 sm:$0xff] }
 0x4c5   :  { %v1194_v18 = vpop.eup %1193 }
 0x4c6   :  { %v536_v19 = vmul.f32 %v1194_v18, %v1192_v62 }
 0x4c8   :  { %v538_v20 = vpack.c.bf16 %v536_v19, %v536_v19 }
 0x4ca   :  { %1062 = vmatmul.msk.bf16.vlgmr.msrb.gmra.mxu0 %vm236_vm10, %v538_v20 }
 0x4da   :  { %1070 = vmatmul.msk.bf16.vlgmr.msra.gmra.mxu0 %vm190_vm8, %v632_v37 }
 0x4eb   :  { %v463_v21 = vpop.f32.mrf.mxu1 }
 0x4f3   :  { %v465_v54 = vpop.f32.mrf.mxu1 }
 0x4fb   :  { %v440_v22 = vpop.f32.mrf.mxu0 }
 0x4fc   :  { %v1479_v23 = vadd.f32 %v463_v21, %v440_v22 }
 0x502   :  { %v521_v7 = vpop.xlane.xlu1 %520 }
 0x503   :  { %v523_v24 = vsub.f32 %v515_v11, %v521_v7  ;;  %v1485_v31 = vpop.f32.mrf.mxu0 }
 0x504   :  { %v466_v21 = vadd.f32 %v465_v54, %v1485_v31  ;;  %v1146_v31 = vld [vmem:[%s1574_s5 + $0x18] sm:$0xff] }
 0x505   :  { %v526_v25 = vmul.f32 1.442695, %v523_v24  ;;  %836 = vmatpush.bf16.msrb.mxu0 %v1146_v31 }
 0x507   :  { %1195 = vpow2.f32 %v526_v25 }
 0x50d   :  { %v1196_v26 = vpop.eup %1195 }
 0x50e   :  { %v531_v27 = vsel %vm236_vm10, %v1196_v26, 0.0 }
 0x50f   :  { %532 = vadd.xlane.f32.xlu0 %v531_v27 }
 0x517   :  { %657 = vmax.xlane.f32.xlu0 %v656_v29 }
 0x52b   :  { %701 = vrot.lane.b32.xlu0 %v1418_v48, %s1254_s16 }
 0x547   :  { %v557_v32 = vpop.f32.mrf.mxu0 }
 0x54f   :  { %v559_v33 = vpop.f32.mrf.mxu0 }
 0x550   :  { %v1144_v33 = vld [vmem:[%s1574_s5 + $0x8] sm:$0xff] }
 0x557   :  { %v650_v34 = vpop.f32.mrf.mxu0 }
 0x558   :  { %v655_v35 = vmul.f32 0.25, %v650_v34 }
 0x55a   :  { %v659_v36 = vsel %vm236_vm10, %v655_v35, -inf }
 0x55b   :  { %660 = vmax.xlane.f32.xlu1 %v659_v36 }
 0x55f   :  { %v652_v37 = vpop.f32.mrf.mxu0 }
 0x560   :  { %v1150_v37 = vld [vmem:[%s1575_s6 + $0x18] sm:$0xff] }
 0x582   :  { %v533_v39 = vpop.xlane.xlu0 %532 }
 0x583   :  { %1197 = vrcp.f32 %v533_v39 }
 0x589   :  { %v1198_v40 = vpop.eup %1197 }
 0x58a   :  { %v537_v41 = vmul.f32 %v1198_v40, %v1196_v26  ;;  %v658_v48 = vpop.xlane.xlu0 %657 }
 0x58b   :  { %v662_v42 = vsub.f32 %v654_v28, %v658_v48 }
 0x58c   :  { %v539_v43 = vpack.c.bf16 %v537_v41, %v537_v41 }
 0x58d   :  { %v664_v44 = vmul.f32 1.442695, %v662_v42 }
 0x58e   :  { %1063 = vmatmul.msk.bf16.vlgmr.msrb.gmra.mxu1 %vm236_vm10, %v539_v43 }
 0x58f   :  { %1199 = vpow2.f32 %v664_v44 }
 0x595   :  { %v1200_v45 = vpop.eup %1199 }
 0x596   :  { %v668_v46 = vsel %vm236_vm10, %v1200_v45, 0.0 }
 0x597   :  { %669 = vadd.xlane.f32.xlu1 %v668_v46 }
 0x59d   :  { %v702_v47 = vpop.permute.xlu0 %701 }
 0x59e   :  { %v707_v49 = vsel %vm264_vm9, %v702_v47, 0 }
 0x59f   :  { %716 = vmatpush.bf16.msrb.mxu2 %v707_v49 }
 0x5b0   :  { %680 = vrot.lane.b32.xlu1 %v1426_v60, %s1254_s16 }
 0x5ce   :  { %v661_v12 = vpop.xlane.xlu1 %660 }
 0x5cf   :  { %v663_v50 = vsub.f32 %v655_v35, %v661_v12  ;;  %v1143_v35 = vld [vmem:[%s1574_s5] sm:$0xff] }
 0x5d1   :  { %v666_v51 = vmul.f32 1.442695, %v663_v50 }
 0x5d3   :  { %1201 = vpow2.f32 %v666_v51 }
 0x5d9   :  { %v1202_v52 = vpop.eup %1201 }
 0x5da   :  { %v671_v53 = vsel %vm236_vm10, %v1202_v52, 0.0 }
 0x5db   :  { %672 = vadd.xlane.f32.xlu2 %v671_v53  ;;  %v1168_v53 = vld [vmem:[%s1578_s9] ss:$0 sm:$0xff] }
 0x60a   :  { %v670_v58 = vpop.xlane.xlu1 %669 }
 0x60b   :  { %v578_v55 = vpop.f32.mrf.mxu1  ;;  %1203 = vrcp.f32 %v670_v58 }
 0x60c   :  { %v582_v56 = vpack.c.bf16 %v578_v55, %v557_v32 }
 0x60e   :  { %1068 = vmatmul.msk.bf16.vlgmr.msra.gmra.mxu2 %vm190_vm8, %v582_v56 }
 0x611   :  { %v1204_v59 = vpop.eup %1203 }
 0x612   :  { %v676_v61 = vmul.f32 %v1204_v59, %v1200_v45 }
 0x613   :  { %v580_v57 = vpop.f32.mrf.mxu1 }
 0x614   :  { %v678_v63 = vpack.c.bf16 %v676_v61, %v676_v61  ;;  %v1148_v61 = vld [vmem:[%s1575_s6 + $0x8] sm:$0xff] }
 0x622   :  { %v681_v62 = vpop.permute.xlu1 %680 }
 0x623   :  { %v686_v60 = vsel %vm264_vm9, %v681_v62, 0  ;;  %v1147_v62 = vld [vmem:[%s1575_s6] sm:$0xff] }
 0x624   :  { %695 = vmatpush.bf16.msra.mxu1 %v686_v60 }
 0x627   :  { %1071 = vmatmul.msk.bf16.vlgmr.msra.gmra.mxu1 %vm236_vm10, %v678_v63  ;;  %v1154_v63 = vld [vmem:[%s1576_s7 + $0x18] sm:$0xff] }
 0x628   :  { %886 = vmatpush.bf16.msrb.mxu1 %v1150_v37  ;;  %978 = vmatpush.bf16.msra.mxu2 %v1154_v63 }
 0x62c   :  { %887 = vmatpush.bf16.msrb.mxu1 %v1149_v38 }
 0x630   :  { %888 = vmatpush.bf16.msrb.mxu1 %v1148_v61 }
 0x634   :  { %889 = vmatpush.bf16.msrb.mxu1 %v1147_v62 }
 0x64e   :  { %v673_v1 = vpop.xlane.xlu2 %672 }
 0x64f   :  { %1205 = vrcp.f32 %v673_v1 }
 0x655   :  { %v1206_v3 = vpop.eup %1205 }
 0x656   :  { %v677_v4 = vmul.f32 %v1206_v3, %v1202_v52 }
 0x658   :  { %v679_v5 = vpack.c.bf16 %v677_v4, %v677_v4 }
 0x65a   :  { %1072 = vmatmul.msk.bf16.vlgmr.msrb.gmra.mxu2 %vm236_vm10, %v679_v5 }
 0x691   :  { %v601_v8 = vpop.f32.mrf.mxu2 }
 0x692   :  { %v606_v9 = vadd.f32 %v601_v8, %v1479_v23 }
 0x699   :  { %v603_v13 = vpop.f32.mrf.mxu2 }
 0x69a   :  { %v607_v23 = vadd.f32 %v603_v13, %v466_v21 }
 0x6a4   :  { %v697_v10 = vpop.f32.mrf.mxu1 }
 0x6ac   :  { %v699_v11 = vpop.f32.mrf.mxu1 }
 0x6ad   :  { %v1152_v11 = vld [vmem:[%s1576_s7 + $0x8] sm:$0xff] }
 0x6dd   :  { %v718_v14 = vpop.f32.mrf.mxu2 }
 0x6de   :  { %v722_v15 = vpack.c.bf16 %v718_v14, %v697_v10  ;;  %v1151_v14 = vld [vmem:[%s1576_s7] sm:$0xff] }
 0x6e0   :  { %1077 = vmatmul.msk.bf16.vlgmr.msrb.gmra.mxu3 %vm190_vm8, %v722_v15 }
 0x6e5   :  { %v720_v16 = vpop.f32.mrf.mxu2 }
 0x763   :  { %v741_v18 = vpop.f32.mrf.mxu3 }
 0x764   :  { %v746_v19 = vadd.f32 %v741_v18, %v606_v9  ;;  %v1153_v9 = vld [vmem:[%s1576_s7 + $0x10] sm:$0xff] }
 0x765   :  { %979 = vmatpush.bf16.msra.mxu2 %v1153_v9 }
 0x766   :  { %v752_v20 = vadd.f32 %v1167_v17, %v746_v19 }
 0x768   :  { %v754_v22 = vadd.f32 %v752_v20, %v1316_v0  ;;  %v1145_v0 = vld [vmem:[%s1574_s5 + $0x10] sm:$0xff] }
 0x769   :  { %837 = vmatpush.bf16.msrb.mxu0 %v1145_v0  ;;  %980 = vmatpush.bf16.msra.mxu2 %v1152_v11 }
 0x76a   :  { %v757_v7 = vmul.f32 %v754_v22, %v754_v22 }
 0x76b   :  { %v743_v24 = vpop.f32.mrf.mxu3 }
 0x76c   :  { %v747_v25 = vadd.f32 %v743_v24, %v607_v23  ;;  %v759_v26 = vsel %vm42_vm0, %v757_v7, 0.0 }
 0x76d   :  { %760 = vadd.xlane.f32.xlu0 %v759_v26  ;;  %838 = vmatpush.bf16.msrb.mxu0 %v1144_v33 }
 0x76e   :  { %v753_v27 = vadd.f32 %v1167_v17, %v747_v25  ;;  %981 = vmatpush.bf16.msra.mxu2 %v1151_v14 }
 0x770   :  { %v755_v28 = vadd.f32 %v753_v27, %v1323_v2 }
 0x771   :  { %839 = vmatpush.bf16.msrb.mxu0 %v1143_v35 }
 0x772   :  { %v758_v29 = vmul.f32 %v755_v28, %v755_v28 }
 0x774   :  { %v762_v32 = vsel %vm42_vm0, %v758_v29, 0.0 }
 0x775   :  { %763 = vadd.xlane.f32.xlu1 %v762_v32 }
 0x7e0   :  { %v761_v34 = vpop.xlane.xlu0 %760 }
 0x7e1   :  { %v765_v2 = vmul.f32 %v761_v34, %v1365_v30 }
 0x7e3   :  { %v767_v36 = vadd.f32 1e-05, %v765_v2 }
 0x7e5   :  { %1207 = vrsqrt.f32 %v767_v36  ;;  %vm775_vm12 = vweird.f32 %v767_v36 }
 0x7e8   :  { %v764_v39 = vpop.xlane.xlu1 %763 }
 0x7e9   :  { %v766_v40 = vmul.f32 %v764_v39, %v1365_v30 }
 0x7eb   :  { %v1208_v41 = vpop.eup %1207  ;;  %v768_v48 = vadd.f32 1e-05, %v766_v40 }
 0x7ec   :  { %v770_v42 = vmul.f32 %v1208_v41, %v767_v36  ;;  %vm776_vm11 = vweird.f32 %v1208_v41 }
 0x7ed   :  { %1209 = vrsqrt.f32 %v768_v48  ;;  %vm777_vm13 = vmor %vm775_vm12, %vm776_vm11  ;;  %vm785_vm15 = vweird.f32 %v768_v48 }
 0x7ee   :  { %v771_v43 = vmul.f32 %v1208_v41, %v770_v42 }
 0x7f0   :  { %v772_v44 = vmul.f32 0.5, %v771_v43  ;;  %v1220_v43 = vld [vmem:[%s1569_s0 + $0x8] sm:$0xff] }
 0x7f2   :  { %v773_v45 = vsub.f32 1.5, %v772_v44 }
 0x7f3   :  { %v1210_v46 = vpop.eup %1209 }
 0x7f4   :  { %v780_v47 = vmul.f32 %v1210_v46, %v768_v48  ;;  %v774_v49 = vmul.f32 %v1208_v41, %v773_v45  ;;  %vm786_vm14 = vweird.f32 %v1210_v46 }
 0x7f5   :  { %vm787_vm1 = vmor %vm785_vm15, %vm786_vm14 }
 0x7f6   :  { %v781_v12 = vmul.f32 %v1210_v46, %v780_v47  ;;  %v778_v51 = vsel %vm777_vm13, %v1208_v41, %v774_v49  ;;  %v1219_v41 = vld [vmem:[%s1569_s0] sm:$0xff] }
 0x7f7   :  { %v789_v54 = vmul.f32 %v778_v51, %v754_v22 }
 0x7f8   :  { %v782_v50 = vmul.f32 0.5, %v781_v12 }
 0x7f9   :  { %v794_v57 = vmul.f32 %v1168_v53, %v789_v54 }
 0x7fa   :  { %v783_v52 = vsub.f32 1.5, %v782_v50 }
 0x7fc   :  { %v784_v30 = vmul.f32 %v1210_v46, %v783_v52 }
 0x7fe   :  { %v788_v55 = vsel %vm787_vm1, %v1210_v46, %v784_v30 }
 0x7ff   :  { %v790_v56 = vmul.f32 %v788_v55, %v755_v28 }
 0x801   :  { %v795_v58 = vmul.f32 %v1168_v53, %v790_v56 }
 0x803   :  { %v796_v59 = vpack.c.bf16 %v795_v58, %v794_v57 }
 0x805   :  { %1094 = vmatmul.msk.bf16.vlgmr.msrb.gmra.mxu0 %vm42_vm0, %v796_v59 }
 0x882   :  { %v841_v60 = vpop.f32.mrf.mxu0 }
 0x883   :  { %v1112_v4 = vmul.f32 -1.442695, %v841_v60 }
 0x885   :  { %1211 = vpow2.f32 %v1112_v4 }
 0x88a   :  { %v843_v1 = vpop.f32.mrf.mxu0 }
 0x88b   :  { %v846_v3 = vpack.c.bf16 %v843_v1, %v841_v60  ;;  %v1113_v5 = vmul.f32 -1.442695, %v843_v1  ;;  %v1212_v6 = vpop.eup %1211 }
 0x88c   :  { %v902_v10 = vadd.f32 1.0, %v1212_v6 }
 0x88d   :  { %1111 = vmatmul.msk.bf16.vlgmr.msrb.gmra.mxu1 %vm42_vm0, %v846_v3  ;;  %1213 = vpow2.f32 %v1113_v5 }
 0x88e   :  { %1215 = vrcp.f32 %v902_v10  ;;  %vm909_vm4 = vweird.f32 %v902_v10  ;;  %v915_v25 = vand.u32 2147483648, %v902_v10  ;;  %v913_v27 = vand.u32 2147483647, %v902_v10 }
 0x890   :  { %v916_v0 = vor.u32 1.1754944e-38, %v915_v25  ;;  %vm914_vm9 = vcmp.eq.f32.partialorder %v913_v27, 8.507059e+37 }
 0x893   :  { %v1214_v8 = vpop.eup %1213 }
 0x894   :  { %v903_v13 = vadd.f32 1.0, %v1214_v8  ;;  %v1216_v15 = vpop.eup %1215 }
 0x895   :  { %v905_v18 = vmul.f32 %v1216_v15, %v902_v10  ;;  %vm910_vm2 = vweird.f32 %v1216_v15 }
 0x896   :  { %1217 = vrcp.f32 %v903_v13  ;;  %v930_v24 = vand.u32 2147483648, %v903_v13  ;;  %vm924_vm5 = vweird.f32 %v903_v13  ;;  %v928_v26 = vand.u32 2147483647, %v903_v13  ;;  %vm911_vm6 = vmor %vm909_vm4, %vm910_vm2 }
 0x897   :  { %v906_v20 = vsub.f32 1.0, %v905_v18 }
 0x898   :  { %v931_v31 = vor.u32 1.1754944e-38, %v930_v24  ;;  %vm929_vm8 = vcmp.eq.f32.partialorder %v928_v26, 8.507059e+37 }
 0x899   :  { %v907_v22 = vmul.f32 %v1216_v15, %v906_v20 }
 0x89b   :  { %v908_v7 = vadd.f32 %v1216_v15, %v907_v22 }
 0x89c   :  { %v1218_v16 = vpop.eup %1217 }
 0x89d   :  { %v920_v17 = vmul.f32 %v1218_v16, %v903_v13  ;;  %vm925_vm3 = vweird.f32 %v1218_v16  ;;  %v912_v32 = vsel %vm911_vm6, %v1216_v15, %v908_v7 }
 0x89e   :  { %vm926_vm7 = vmor %vm924_vm5, %vm925_vm3  ;;  %v917_v34 = vsel %vm914_vm9, %v916_v0, %v912_v32 }
 0x89f   :  { %v921_v19 = vsub.f32 1.0, %v920_v17  ;;  %v934_v35 = vmul.f32 %v917_v34, %v841_v60 }
 0x8a1   :  { %v922_v21 = vmul.f32 %v1218_v16, %v921_v19 }
 0x8a3   :  { %v923_v23 = vadd.f32 %v1218_v16, %v922_v21 }
 0x8a5   :  { %v927_v29 = vsel %vm926_vm7, %v1218_v16, %v923_v23 }
 0x8a6   :  { %v932_v33 = vsel %vm929_vm8, %v931_v31, %v927_v29 }
 0x8a7   :  { %v935_v2 = vmul.f32 %v932_v33, %v843_v1 }
 0x90a   :  { %v891_v28 = vpop.f32.mrf.mxu1 }
 0x90b   :  { %v936_v37 = vmul.f32 %v934_v35, %v891_v28 }
 0x912   :  { %v893_v36 = vpop.f32.mrf.mxu1 }
 0x913   :  { %v937_v38 = vmul.f32 %v935_v2, %v893_v36 }
 0x915   :  { %v938_v39 = vpack.c.bf16 %v937_v38, %v936_v37 }
 0x917   :  { %1130 = vmatmul.msk.bf16.vlgmr.msra.gmra.mxu2 %vm42_vm0, %v938_v39 }
 0x99a   :  { %v983_v40 = vpop.f32.mrf.mxu2 }
 0x99b   :  { %v984_v48 = vadd.f32 %v1219_v41, %v983_v40 }
 0x99d   :  { %988 = vst.msk [vmem:[#allocation2] sm:$0xff] %vm42_vm0, %v984_v48 }
 0x9a2   :  { %v985_v42 = vpop.f32.mrf.mxu2 }
 0x9a3   :  { %v986_v44 = vadd.f32 %v1220_v43, %v985_v42 }
 0x9a5   :  { %989 = vst.msk [vmem:[#allocation2 + $0x8] sm:$0xff] %vm42_vm0, %v986_v44 }
 0x9a6   :  { %1002 = dma.vmem_to_hbm [thread:$0]  %s995_s3, 256, %s997_s28, [#allocation3], %s1256_s30, %s1256_s30, %s1257_s11  }
 0x9a7   :  { %1245 = dma.done.wait [#allocation3], 256  }
 0x9a8   :  { %1246 = vsyncadd [#allocation3], 4294967040 }
 0x9a9   :  { %1007 = vsyncpa [#allocation3], 1 }

</bundles_post_ra>
